<compile_context>
chip_gen: v5e
topology: v5e:2x2
jax: 0.10.0
libtpu: 0.0.40
codegen_flags: <defaults>
</compile_context>

<pallas_src>
import functools

import jax
import jax.numpy as jnp
from jax.experimental import pallas as pl
from jax.experimental.pallas import tpu as pltpu

_LANE = 128


def _layernorm_kernel(x_ref, scale_ref, shift_ref, o_ref, *, eps, hidden):
    """Normalize each row of a (block_rows, hidden_padded) tile."""
    x = x_ref[...].astype(jnp.float32)
    inv_n = 1.0 / hidden                                  # TRUE hidden (not padded)
    # padded lanes of x are zero, so the sum only sees true lanes
    mean = jnp.sum(x, axis=-1, keepdims=True) * inv_n
    centered = x - mean
    if hidden != x.shape[-1]:
        # padded lanes would contribute mean^2 to the variance -> mask them out
        lane = jax.lax.broadcasted_iota(jnp.int32, x.shape, dimension=x.ndim - 1)
        sq = jnp.where(lane < hidden, centered * centered, 0.0)
    else:
        sq = centered * centered
    var = jnp.sum(sq, axis=-1, keepdims=True) * inv_n     # biased (unbiased=False)
    inv = jax.lax.rsqrt(var + eps)
    # scale/shift already f32; padded lanes are zero so padded output lanes are
    # zero (sliced off in the wrapper).
    out = centered * (inv * scale_ref[...]) + shift_ref[...]
    o_ref[...] = out.astype(o_ref.dtype)


def _vmem_capacity_bytes():
    try:
        return int(pltpu.get_tpu_info().vmem_capacity_bytes)
    except Exception:
        return 64 * 1024 * 1024    # conservative fallback (v7x-sized)


def _choose_block_rows(rows, hidden_p, in_dtype, out_dtype, cap_bytes):
    in_b = jnp.dtype(in_dtype).itemsize
    out_b = jnp.dtype(out_dtype).itemsize
    # packed sublanes: multiples of 16 for sub-32-bit dtypes, 8 for f32
    mult = 16 if min(in_b, out_b) < 4 else 8

    # generation-aware budget for the pipelined tiles + f32 temps:
    #   ~36 MiB on v7x (64 MiB VMEM), 64 MiB on v5e/v6e (128 MiB VMEM)
    budget = min((cap_bytes * 9) // 16, 64 << 20)
    # per-row VMEM: double-buffered in + out DMA tiles, plus ~3 f32 working
    # copies inside the kernel (x_f32, centered, out before downcast).
    per_row = hidden_p * (2 * (in_b + out_b) + 3 * 4)

    br = max(mult, ((budget // max(per_row, 1)) // mult) * mult)

    # never larger than the (rounded-up) row count
    rows_rounded = ((rows + mult - 1) // mult) * mult
    br = min(br, rows_rounded)

    # keep >=2 (ideally >=4) grid steps so both v7x TensorCores get work from
    # the "parallel" axis; negligible cost (~0.35us/step) on single-TC chips.
    if rows >= 4 * mult:
        target_steps = 4
    elif rows >= 2 * mult:
        target_steps = 2
    else:
        target_steps = 1
    if target_steps > 1:
        cap = max(mult, (((rows + target_steps - 1) // target_steps) // mult) * mult)
        br = min(br, cap)
    return int(br), mult


def layer_norm(x, scale, shift, *, eps=1e-5, block_rows=None):
    """LayerNorm over the last axis of x, matching the PyTorch module."""
    orig_shape = x.shape
    hidden = orig_shape[-1]
    rows = 1
    for d in orig_shape[:-1]:
        rows *= d
    x2d = x.reshape(rows, hidden)                          # free row-major flatten

    # Lane-dense hidden: pad to a multiple of 128 when needed (kernel masks the
    # pad out of the statistics and divides by the true hidden).
    hidden_p = ((hidden + _LANE - 1) // _LANE) * _LANE
    pad = hidden_p - hidden
    if pad:
        x2d = jnp.pad(x2d, ((0, 0), (0, pad)))

    # params: tiny -> cast to f32 once; constant index_map keeps them resident.
    scale2d = scale.reshape(1, hidden).astype(jnp.float32)
    shift2d = shift.reshape(1, hidden).astype(jnp.float32)
    if pad:
        scale2d = jnp.pad(scale2d, ((0, 0), (0, pad)))
        shift2d = jnp.pad(shift2d, ((0, 0), (0, pad)))

    cap_bytes = _vmem_capacity_bytes()
    if block_rows is None:
        block_rows, _ = _choose_block_rows(rows, hidden_p, x.dtype, x.dtype, cap_bytes)

    in_b = jnp.dtype(x.dtype).itemsize
    out_b = in_b
    # scoped-VMEM limit: double-buffered in/out tiles + f32 temps + params + headroom
    tile_io = block_rows * hidden_p * (in_b + out_b)
    temps = 3 * block_rows * hidden_p * 4
    params = 2 * hidden_p * 4
    need = 2 * tile_io + temps + 2 * params + (4 << 20)
    vmem_limit = int(min(max(need, 16 << 20), (cap_bytes * 7) // 8))

    grid = (pl.cdiv(rows, block_rows),)                    # partial last block OK
    out2d = pl.pallas_call(
        functools.partial(_layernorm_kernel, eps=eps, hidden=hidden),
        out_shape=jax.ShapeDtypeStruct((rows, hidden_p), x.dtype),
        grid_spec=pltpu.PrefetchScalarGridSpec(
            num_scalar_prefetch=0,
            grid=grid,
            in_specs=[
                pl.BlockSpec((block_rows, hidden_p), lambda i: (i, 0)),
                pl.BlockSpec((1, hidden_p), lambda i: (0, 0)),
                pl.BlockSpec((1, hidden_p), lambda i: (0, 0)),
            ],
            out_specs=pl.BlockSpec((block_rows, hidden_p), lambda i: (i, 0)),
        ),
        compiler_params=pltpu.CompilerParams(
            dimension_semantics=("parallel",),
            vmem_limit_bytes=vmem_limit,
        ),
    )(x2d, scale2d, shift2d)

    if pad:
        out2d = out2d[:, :hidden]
    return out2d.reshape(orig_shape)


def _reference(x, scale, shift, eps):
    mean = jnp.mean(x, axis=-1, keepdims=True)
    var = jnp.mean((x - mean) ** 2, axis=-1, keepdims=True)
    return scale * ((x - mean) / jnp.sqrt(var + eps)) + shift


if __name__ == "__main__":
    key = jax.random.PRNGKey(0)

    # Main check: small shape implied by the module (non-128-aligned hidden ->
    # exercises the lane-padding + masked-variance path).
    batch, seq, hidden = 2, 8, 32
    x = jax.random.normal(key, (batch, seq, hidden), dtype=jnp.float32)
    scale = jnp.ones((hidden,), dtype=jnp.float32)   # module init: ones / zeros
    shift = jnp.zeros((hidden,), dtype=jnp.float32)

    out = jax.block_until_ready(layer_norm(x, scale, shift, eps=1e-5))
    ref = _reference(x, scale, shift, 1e-5)
    assert jnp.allclose(out, ref, atol=1e-5, rtol=1e-5), "mismatch vs reference (hidden=32)"

    # Secondary check: 128-aligned hidden (no padding path, multi-step grid).
    k2 = jax.random.PRNGKey(1)
    x2 = jax.random.normal(k2, (4, 128, 256), dtype=jnp.float32)
    s2 = jax.random.normal(jax.random.PRNGKey(2), (256,), dtype=jnp.float32)
    b2 = jax.random.normal(jax.random.PRNGKey(3), (256,), dtype=jnp.float32)
    out2 = jax.block_until_ready(layer_norm(x2, s2, b2, eps=1e-5))
    ref2 = _reference(x2, s2, b2, 1e-5)
    assert jnp.allclose(out2, ref2, atol=1e-4, rtol=1e-4), "mismatch vs reference (hidden=256)"

    print("KERNEL_OK")
</pallas_src>

<mosaic_0001>
module attributes {stable_mosaic.version = 11 : i64} {
  func.func @_layernorm_kernel(%arg0: i32, %arg1: memref<8x128xf32, #tpu.memory_space<vmem>>, %arg2: memref<1x128xf32, #tpu.memory_space<vmem>>, %arg3: memref<1x128xf32, #tpu.memory_space<vmem>>, %arg4: memref<8x128xf32, #tpu.memory_space<vmem>>) attributes {dimension_semantics = [#tpu.dimension_semantics<parallel>], iteration_bounds = array<i64: 2>, scalar_prefetch = 0 : i64, scratch_operands = 0 : i64, tpu.core_type = #tpu.core_type<tc>, window_params = [{transform_indices = @transform_0, window_bounds = array<i64: 8, 128>}, {pipeline_mode = #tpu.pipeline_mode<synchronous>, transform_indices = @transform_1, window_bounds = array<i64: 1, 128>}, {pipeline_mode = #tpu.pipeline_mode<synchronous>, transform_indices = @transform_2, window_bounds = array<i64: 1, 128>}, {transform_indices = @transform_3, window_bounds = array<i64: 8, 128>}]} {
    %c0 = arith.constant 0 : index
    %c0_0 = arith.constant 0 : index
    %0 = vector.load %arg1[%c0, %c0_0] : memref<8x128xf32, #tpu.memory_space<vmem>>, vector<8x128xf32>
    %cst = arith.constant dense<0.000000e+00> : vector<8xf32>
    %1 = vector.multi_reduction <add>, %0, %cst [1] : vector<8x128xf32> to vector<8xf32>
    %2 = vector.shape_cast %1 : vector<8xf32> to vector<8x1xf32>
    %cst_1 = arith.constant 3.125000e-02 : f32
    %3 = vector.broadcast %cst_1 : f32 to vector<8x1xf32>
    %4 = arith.mulf %2, %3 : vector<8x1xf32>
    %5 = vector.broadcast %4 : vector<8x1xf32> to vector<8x128xf32>
    %6 = arith.subf %0, %5 : vector<8x128xf32>
    %7 = tpu.iota {dimensions = array<i32: 1>} : vector<8x128xi32>
    %c32_i32 = arith.constant 32 : i32
    %8 = vector.broadcast %c32_i32 : i32 to vector<8x128xi32>
    %9 = arith.cmpi slt, %7, %8 : vector<8x128xi32>
    %10 = arith.mulf %6, %6 : vector<8x128xf32>
    %cst_2 = arith.constant 0.000000e+00 : f32
    %11 = vector.broadcast %cst_2 : f32 to vector<8x128xf32>
    %12 = arith.select %9, %10, %11 : vector<8x128xi1>, vector<8x128xf32>
    %cst_3 = arith.constant dense<0.000000e+00> : vector<8xf32>
    %13 = vector.multi_reduction <add>, %12, %cst_3 [1] : vector<8x128xf32> to vector<8xf32>
    %14 = vector.shape_cast %13 : vector<8xf32> to vector<8x1xf32>
    %cst_4 = arith.constant 3.125000e-02 : f32
    %15 = vector.broadcast %cst_4 : f32 to vector<8x1xf32>
    %16 = arith.mulf %14, %15 : vector<8x1xf32>
    %cst_5 = arith.constant 9.99999974E-6 : f32
    %17 = vector.broadcast %cst_5 : f32 to vector<8x1xf32>
    %18 = arith.addf %16, %17 : vector<8x1xf32>
    %19 = math.rsqrt %18 : vector<8x1xf32>
    %c0_6 = arith.constant 0 : index
    %c0_7 = arith.constant 0 : index
    %20 = vector.load %arg2[%c0_6, %c0_7] : memref<1x128xf32, #tpu.memory_space<vmem>>, vector<1x128xf32>
    %21 = vector.broadcast %19 : vector<8x1xf32> to vector<8x128xf32>
    %22 = vector.broadcast %20 : vector<1x128xf32> to vector<8x128xf32>
    %23 = arith.mulf %21, %22 : vector<8x128xf32>
    %24 = arith.mulf %6, %23 : vector<8x128xf32>
    %c0_8 = arith.constant 0 : index
    %c0_9 = arith.constant 0 : index
    %25 = vector.load %arg3[%c0_8, %c0_9] : memref<1x128xf32, #tpu.memory_space<vmem>>, vector<1x128xf32>
    %26 = vector.broadcast %25 : vector<1x128xf32> to vector<8x128xf32>
    %27 = arith.addf %24, %26 : vector<8x128xf32>
    %c0_10 = arith.constant 0 : index
    %c0_11 = arith.constant 0 : index
    %28 = vector.load %arg4[%c0_10, %c0_11] : memref<8x128xf32, #tpu.memory_space<vmem>>, vector<8x128xf32>
    tpu.vector_store %arg4[%c0_10, %c0_11], %27 {strides = array<i32>} : memref<8x128xf32, #tpu.memory_space<vmem>>, vector<8x128xf32>,
    return
  }
  func.func @transform_0(%arg0: i32) -> (i32, i32) {
    %c0_i32 = arith.constant 0 : i32
    %c0_i32_0 = arith.constant 0 : i32
    return %arg0, %c0_i32 : i32, i32
  }
  func.func @transform_1(%arg0: i32) -> (i32, i32) {
    %c0_i32 = arith.constant 0 : i32
    %c0_i32_0 = arith.constant 0 : i32
    %c0_i32_1 = arith.constant 0 : i32
    return %c0_i32, %c0_i32_0 : i32, i32
  }
  func.func @transform_2(%arg0: i32) -> (i32, i32) {
    %c0_i32 = arith.constant 0 : i32
    %c0_i32_0 = arith.constant 0 : i32
    %c0_i32_1 = arith.constant 0 : i32
    return %c0_i32, %c0_i32_0 : i32, i32
  }
  func.func @transform_3(%arg0: i32) -> (i32, i32) {
    %c0_i32 = arith.constant 0 : i32
    %c0_i32_0 = arith.constant 0 : i32
    return %arg0, %c0_i32 : i32, i32
  }
}

</mosaic_0001>

<bundles_post_ra>
// kernel: tpu_custom_call.1
= control target key start
LH: loop header
LB: loop body
LE: loop exit
PB: predicated region body
PF: predicated region fallthrough
CT: control target
= control target key end

     0   :  { %8 = vsyncpa [#allocation3], 0  ;;  %s708_s0 = inlined_call_operand.hbm [shape: f32[16,128], index: 0, kind: input, shape index: {}]   ;;  %s709_s1 = inlined_call_operand.hbm [shape: f32[1,128], index: 1, kind: input, shape index: {}]   ;;  %s710_s2 = inlined_call_operand.vmem [shape: f32[1,128], index: 2, kind: input, shape index: {}]   ;;  %s711_s3 = inlined_call_operand.hbm [shape: f32[16,128], index: 3, kind: output, shape index: {}]  }
   0x1   :  { %10 = vsyncpa [#allocation3 + $0x1], 0 }
   0x2   :  { %11 = vsyncpa [#allocation6], 0 }
   0x3   :  { %12 = vsyncpa [#allocation4], 0 }
   0x4   :  { %14 = vsyncpa [#allocation4 + $0x1], 0  ;;  %s563_s12 = smov 0   ;;  %s565_s13 = smov 0  }
   0x5   :  { %s567_s14 = smov 0   ;;  %s569_s15 = smov 0  }
   0x6 LB: > { %s584_s16 = sadd.s32 4294967295, %s540_s15   ;;  %s335_s17 = sadd.s32 4294967294, %s540_s15   ;;  %s540_s15 = sphi %s569_s15, %s721_s15   ;;  %s536_s14 = sphi %s567_s14, %s720_s14   ;;  %s532_s13 = sphi %s565_s13, %s719_s13   ;;  %s528_s12 = sphi %s563_s12, %s718_s12  }
   0x7   : > { %p40_p0 = scmp.ne.s32.totalorder %s532_s13, %s528_s12  ;;  %p41_p1 = scmp.eq.s32.totalorder %s584_s16, 0 }
   0x8   : > { %p106_p2 = scmp.eq.s32.totalorder %s584_s16, 1  ;;  %p112_p3 = scmp.eq.s32.totalorder %s335_s17, 1 }
   0x9   : > { %p593_p4 = por %p41_p1, %p40_p0  ;;  %p336_p5 = scmp.ge.s32.totalorder %s540_s15, 1 }
   0xa   : > { %p598_p6 = por %p112_p3, %p40_p0  ;;  %p119_p7 = scmp.lt.s32.totalorder %s540_s15, 3 }
   0xb   : > { %s131_s22 = sshll.u32 %s709_s1, 4  ;;  %s542_s24 = smov [#allocation5]   ;;  %s132_s22 = int_to_ptr.hbm [resolvable:$true] %s131_s22 }
   0xc   : > { %p606_p8 = pnand %p336_p5, %p119_p7  ;;  %s133_s25 = sshll.u32 %s542_s24, 4  ;;  %s134_s25 = int_to_ptr.vmem [resolvable:$true] %s133_s25 }
   0xd   : > { %s616_s26 = sadd.s32 1, %s540_s15   ;;  %s27_s27 = sadd.s32 1, %s536_s14 }
   0xe   : > { %p357_p10 = pneg %p606_p8  ;;  %s24_s28 = ssub.s32 %s540_s15, %s616_s26 }
   0xf   : > { %p25_p12 = scmp.eq.s32.totalorder %s24_s28, 0  ;;  %p34_p13 = scmp.ne.s32.totalorder %s536_s14, %s532_s13 }
  0x10   : > { %p358_p11 = pnand %p357_p10, %p41_p1  ;;  %p35_p0 = scmp.eq.s32.totalorder %s540_s15, 0 }
  0x11   : > { %s625_s29 = scalar_select %p25_p12, %s536_s14, %s27_s27  }
  0x12   : > { %360 = dma.hbm_to_vmem [thread:$0]  (!%p358_p11), %s132_s22, 16, %s134_s25, [#allocation6]  }
  0x13   : > { %p629_p3 = por %p106_p2, %p34_p13  ;;  %p370_p5 = scmp.lt.s32.totalorder %s540_s15, 2 }
  0x14   : > { %s147_s4 = sand.u32 1, %s536_s14   ;;  %s340_s5 = sshll.u32 %s540_s15, 3 }
  0x15   : > { %p36_p7 = por %p35_p0, %p34_p13  ;;  %s339_s6 = sshll.u32 %s147_s4, 3 }
  0x16   : > { %s155_s9 = scalar_lea.hbm %s708_s0, %s340_s5  ;;  %s151_s11 = scalar_lea.vmem [#allocation2], %s339_s6 }
  0x17   : > { %s157_s10 = sshll.u32 %s155_s9, 4  ;;  %s159_s17 = sshll.u32 %s151_s11, 4  ;;  %s158_s10 = int_to_ptr.hbm [resolvable:$true] %s157_s10  ;;  %s160_s17 = int_to_ptr.vmem [resolvable:$true] %s159_s17 }
  0x18   : > { %p639_p10 = pnand %p370_p5, %p36_p7  ;;  %s148_s21 = scalar_lea.sflag [#allocation3], %s147_s4 }
  0x19   : > { %s440_s22 = sshra.s32 %s158_s10, 4  ;;  %s447_s28 = scalar_lea.hbm %s708_s0, 16  ;;  %s441_s22 = int_to_ptr.hbm [resolvable:$true] %s440_s22 }
  0x1a   : > { %s442_s24 = scalar_lea.hbm %s441_s22, 8  ;;  %p444_p11 = pneg %p639_p10 }
  0x1b   : > { %p443_p2 = scmp.ne.s32.totalorder %s441_s22, %s442_s24  ;;  %p448_p0 = scmp.lt.s32.totalorder %s441_s22, %s708_s0 }
  0x1c   : > { %p449_p5 = scmp.lt.s32.totalorder %s447_s28, %s442_s24 }
  0x1d   : > { %p445_p12 = pnand %p444_p11, %p443_p2 }
  0x1e   : > { %p450_p7 = por %p449_p5, %p448_p0 }
  0x1f   : > { %p446_p13 = pneg %p445_p12 }
  0x21   : > { %p451_p9 = pnand %p450_p7, %p446_p13 }
  0x23   : > { %454 = shalt.err (!%p451_p9)
}
  0x24   : > { %364 = dma.hbm_to_vmem [thread:$0]  (!%p639_p10), %s158_s10, 128, %s160_s17, %s148_s21  }
  0x25   : > { %168 = sbr.rel (%p606_p8) target bundleno = 316 (0x13c), region = 32  ;;  %s656_s4 = sand.u32 (!%p606_p8), 1, %s532_s13  }
  0x26   : > { %s342_s7 = sshll.u32 (!%p606_p8), %s656_s4, 3  ;;  %s171_s8 = scalar_lea.sflag (!%p606_p8), [#allocation3], %s656_s4 }
  0x27   : > { %s174_s9 = scalar_lea.vmem (!%p606_p8), [#allocation2], %s342_s7 }
  0x2a   : > { %515 = dma.done.wait (%p593_p4), %s171_s8, 128  }
  0x2b   : > { %517 = vsyncadd (%p593_p4), %s171_s8, 4294967168 }
  0x2c   : > { %519 = dma.done.wait (%p41_p1), [#allocation6], 16  }
  0x2d   : > { %521 = vsyncadd (%p41_p1), [#allocation6], 4294967280  ;;  %v203_v0 = vld [vmem:[%s174_s9] sm:$0xff]  ;;  %v208_v1 = vlaneseq  ;;  %s346_s18 = sshll.u32 %s584_s16, 3  ;;  %v406_v16 = vld [vmem:[#allocation5] ss:$0 sm:$0xff] }
  0x2e   : > { %204 = vadd.xlane.f32.xlu0 %v203_v0  ;;  %s250_s11 = scalar_lea.hbm %s711_s3, %s346_s18  ;;  %v407_v20 = vld [vmem:[%s710_s2] ss:$0 sm:$0xff]  ;;  %s202_s21 = scalar_lea.vmem [#allocation7], %s342_s7 }
  0x2f   : > { %v209_v3 = vand.u32 127, %v208_v1  ;;  %s252_s22 = sshll.u32 %s202_s21, 4  ;;  %s254_s16 = sshll.u32 %s250_s11, 4  ;;  %s253_s22 = int_to_ptr.vmem [resolvable:$true] %s252_s22  ;;  %s255_s16 = int_to_ptr.hbm [resolvable:$true] %s254_s16 }
  0x30   : > { %s240_s24 = scalar_lea.sflag [#allocation4], %s656_s4  ;;  %s484_s25 = sshra.s32 %s255_s16, 4  ;;  %s485_s25 = int_to_ptr.hbm [resolvable:$true] %s484_s25 }
  0x31   : > { %vm210_vm0 = vcmp.lt.s32.totalorder %v209_v3, 32  ;;  %s486_s27 = scalar_lea.hbm %s485_s25, 8  ;;  %s490_s6 = scalar_lea.hbm %s711_s3, 16 }
  0x32   : > { %p487_p1 = scmp.ne.s32.totalorder %s485_s25, %s486_s27  ;;  %p491_p9 = scmp.lt.s32.totalorder %s485_s25, %s711_s3 }
  0x33   : > { %p492_p10 = scmp.lt.s32.totalorder %s490_s6, %s486_s27 }
  0x34   : > { %p488_p4 = pnand %p487_p1, %p629_p3 }
  0x35   : > { %p493_p2 = por %p492_p10, %p491_p9 }
  0x36   : > { %p489_p8 = pneg %p488_p4 }
  0x38   : > { %p494_p11 = pnand %p493_p2, %p489_p8 }
  0xa1   : > { %v205_v2 = vpop.xlane.xlu0 %204 }
  0xa2   : > { %v206_v4 = vmul.f32 0.03125, %v205_v2 }
  0xa4   : > { %v207_v5 = vsub.f32 %v203_v0, %v206_v4 }
  0xa6   : > { %v211_v6 = vmul.f32 %v207_v5, %v207_v5 }
  0xa8   : > { %v212_v7 = vsel %vm210_vm0, %v211_v6, 0.0 }
  0xa9   : > { %213 = vadd.xlane.f32.xlu0 %v212_v7 }
 0x11c   : > { %v214_v8 = vpop.xlane.xlu0 %213 }
 0x11d   : > { %v215_v9 = vmul.f32 0.03125, %v214_v8 }
 0x11f   : > { %v216_v10 = vadd.f32 1e-05, %v215_v9 }
 0x121   : > { %408 = vrsqrt.f32 %v216_v10  ;;  %vm223_vm2 = vweird.f32 %v216_v10 }
 0x127   : > { %v409_v11 = vpop.eup %408 }
 0x128   : > { %v218_v12 = vmul.f32 %v409_v11, %v216_v10  ;;  %vm224_vm1 = vweird.f32 %v409_v11 }
 0x129   : > { %vm225_vm3 = vmor %vm223_vm2, %vm224_vm1 }
 0x12a   : > { %v219_v13 = vmul.f32 %v409_v11, %v218_v12 }
 0x12c   : > { %v220_v14 = vmul.f32 0.5, %v219_v13 }
 0x12e   : > { %v221_v15 = vsub.f32 1.5, %v220_v14 }
 0x130   : > { %v222_v17 = vmul.f32 %v409_v11, %v221_v15 }
 0x132   : > { %v226_v18 = vsel %vm225_vm3, %v409_v11, %v222_v17 }
 0x133   : > { %v231_v19 = vmul.f32 %v406_v16, %v226_v18 }
 0x135   : > { %v232_v21 = vmul.f32 %v231_v19, %v207_v5 }
 0x137   : > { %v237_v22 = vadd.f32 %v407_v20, %v232_v21 }
 0x139   : > { %238 = vst [vmem:[%s202_s21] sm:$0xff] %v237_v22 }
 0x13a   : > { %497 = shalt.err (!%p494_p11)
}
 0x13b   : > { %355 = dma.vmem_to_hbm [thread:$0]  (%p629_p3), %s253_s22, 128, %s255_s16, %s240_s24  }
 0x13c PF: > { %s266_s4 = sand.u32 1, %s528_s12   ;;  %p717_p12 = scmp.ge.s32.totalorder %s540_s15, 2 }
 0x13d   : > { %s267_s9 = scalar_lea.sflag [#allocation4], %s266_s4 }
 0x13e   : > { %p366_p13 = pnand %p717_p12, %p598_p6 }
 0x140   : > { %p367_p0 = pneg %p366_p13 }
 0x142   : > { %523 = dma.done.wait (%p367_p0), %s267_s9, 128  }
 0x143   : > { %525 = vsyncadd (%p367_p0), %s267_s9, 4294967168  ;;  %p17_p5 = scmp.ge.s32.totalorder %s616_s26, 4   ;;  %s718_s12 = smov %s532_s13 }
 0x144   : > { %s719_s13 = smov %s536_s14  ;;  %s720_s14 = smov %s625_s29 }
 0x145   : > { %s721_s15 = smov %s616_s26  ;;  %19 = sbr.rel (!%p17_p5) target bundleno = 6 (0x6), region = 81 }
 0x14a   :  { %273 = vsyncpa [#allocation3], 1 }
 0x14b   :  { %275 = vsyncpa [#allocation3 + $0x1], 1 }
 0x14c   :  { %276 = vsyncpa [#allocation6], 1 }
 0x14d   :  { %277 = vsyncpa [#allocation4], 1 }
 0x14e   :  { %279 = vsyncpa [#allocation4 + $0x1], 1 }

</bundles_post_ra>
